<compile_context>
chip_gen: v7x
topology: tpu7x:2x2x1
jax: 0.10.0
libtpu: 0.0.40
codegen_flags: <defaults>
</compile_context>

<pallas_src>
import functools

import jax
import jax.numpy as jnp
from jax.experimental import pallas as pl
from jax.experimental.pallas import tpu as pltpu


# --------------------------------------------------------------------------
# helpers
# --------------------------------------------------------------------------
def _vmem_limit_bytes():
    """Generation-aware scoped-VMEM limit: well above the <~8 MiB the kernels
    actually use, well under physical capacity (v5e/v6e 128 MiB, v7x 64 MiB)
    so compiler-internal scratch and surrounding fusions keep headroom."""
    try:
        cap = int(pltpu.get_tpu_info().vmem_capacity_bytes)
    except Exception:  # non-TPU host / interpret mode
        cap = 64 * 1024 * 1024
    return max(32 * 1024 * 1024, min(cap // 2, 64 * 1024 * 1024))


_VMEM_LIMIT = _vmem_limit_bytes()


def _pick_spatial_tile(s_pad, cap=4096):
    """s_pad is a multiple of 128 (wrapper pads).  Pick the largest tile <= cap
    dividing s_pad, preferring a choice that yields >=2 tiles so v7x's two
    TensorCores both get a non-degenerate parallel grid axis."""
    best = None
    for t in (4096, 2048, 1024, 512, 256, 128):
        if t <= cap and t <= s_pad and s_pad % t == 0:
            if best is None:
                best = t
            if s_pad // t >= 2:
                return t
    return best if best is not None else s_pad


def _bilinear_matrix(out_size, in_size):
    """Row-interpolation matrix matching F.interpolate(mode='bilinear',
    align_corners=False) semantics (incl. clamping of negative src coords)."""
    scale = in_size / out_size
    dst = jnp.arange(out_size, dtype=jnp.float32)
    src = (dst + 0.5) * scale - 0.5
    src = jnp.maximum(src, 0.0)
    i0 = jnp.minimum(jnp.floor(src).astype(jnp.int32), in_size - 1)
    i1 = jnp.minimum(i0 + 1, in_size - 1)
    frac = src - i0.astype(jnp.float32)
    m = jnp.zeros((out_size, in_size), jnp.float32)
    rows = jnp.arange(out_size)
    m = m.at[rows, i0].add(1.0 - frac)
    m = m.at[rows, i1].add(frac)
    return m


# --------------------------------------------------------------------------
# fused backbone heads: patch-embed matmul + depth head + dino head + PE add
# --------------------------------------------------------------------------
def _fused_head_kernel(x_ref, wf_ref, bf_ref, wh_ref, bh_ref, pe_ref,
                       feat_ref, dino_ref, dinope_ref, depth_ref):
    # x_ref:  (BV, K, ts)  bf16 patch pixels (channels-first, spatial in lanes)
    # wf_ref: (Z, K)       bf16 trunk weight (transposed)
    # wh_ref: (D+1, Z)     bf16 [dino_head ; depth_head] weights (transposed)
    # pe_ref: (D, ts)      f32  positional-embedding tile
    BV = x_ref.shape[0]
    D = dino_ref.shape[1]

    wf = wf_ref[...].astype(jnp.float32)                                # [Z, K]
    wh = wh_ref[...].astype(jnp.float32)                                # [D+1, Z]
    bf = bf_ref[...]
    bh = bh_ref[...]
    pe = pe_ref[...]

    # BV is small and static -> unrolled; keeps weights/PE resident while the
    # per-step HBM traffic is multiplied by BV (amortizes step overhead).
    for b in range(BV):
        x = x_ref[b].astype(jnp.float32)                                # [K, ts]
        f = jnp.dot(wf, x, preferred_element_type=jnp.float32)          # [Z, ts]
        f = jnp.maximum(f + bf, 0.0)
        feat_ref[b] = f.astype(feat_ref.dtype)                          # bf16 store

        h = jnp.dot(wh, f, preferred_element_type=jnp.float32) + bh     # [D+1, ts]
        dino = h[:D, :]
        dino_ref[b] = dino.astype(dino_ref.dtype)                       # bf16 store
        dinope_ref[b] = (dino + pe).astype(dinope_ref.dtype)            # fused PE add
        depth_ref[b] = jnp.maximum(h[D:D + 1, :], 0.0)                  # lane-dense row


def fused_backbone_heads(patches_t, wf_t, bf, wh_t, bh, pe_t):
    """patches_t: [BV, K, S_pad] bf16 ; pe_t: [D, S_pad] f32.
    Returns (feats bf16 [BV,Z,S_pad], dino bf16, dino+pe bf16, depth f32)."""
    BV, K, S_pad = patches_t.shape
    Z = wf_t.shape[0]
    D1 = wh_t.shape[0]
    D = D1 - 1
    ts = _pick_spatial_tile(S_pad)
    nS = S_pad // ts

    return pl.pallas_call(
        _fused_head_kernel,
        out_shape=(jax.ShapeDtypeStruct((BV, Z, S_pad), jnp.bfloat16),
                   jax.ShapeDtypeStruct((BV, D, S_pad), jnp.bfloat16),
                   jax.ShapeDtypeStruct((BV, D, S_pad), jnp.bfloat16),
                   jax.ShapeDtypeStruct((BV, 1, S_pad), jnp.float32)),
        grid_spec=pltpu.PrefetchScalarGridSpec(
            num_scalar_prefetch=0,
            grid=(nS,),
            in_specs=[pl.BlockSpec((BV, K, ts), lambda i: (0, 0, i)),
                      pl.BlockSpec((Z, K), lambda i: (0, 0)),
                      pl.BlockSpec((Z, 1), lambda i: (0, 0)),
                      pl.BlockSpec((D1, Z), lambda i: (0, 0)),
                      pl.BlockSpec((D1, 1), lambda i: (0, 0)),
                      pl.BlockSpec((D, ts), lambda i: (0, i))],
            out_specs=(pl.BlockSpec((BV, Z, ts), lambda i: (0, 0, i)),
                       pl.BlockSpec((BV, D, ts), lambda i: (0, 0, i)),
                       pl.BlockSpec((BV, D, ts), lambda i: (0, 0, i)),
                       pl.BlockSpec((BV, 1, ts), lambda i: (0, 0, i))),
        ),
        compiler_params=pltpu.CompilerParams(
            dimension_semantics=("parallel",),
            vmem_limit_bytes=_VMEM_LIMIT),
    )(patches_t, wf_t, bf, wh_t, bh, pe_t)


# --------------------------------------------------------------------------
# PE head: 1x1 conv fused with a single-pass BatchNorm (batch statistics).
# The [D, S_pad] output block is VMEM-resident (constant index map), so the
# conv result is computed once, statistics use a centered variance, and the
# output is written to HBM exactly once.  Padded lanes are masked out of the
# statistics.
# --------------------------------------------------------------------------
def _pe_head_kernel(x_ref, w_ref, b_ref, g_ref, bt_ref, o_ref, sum_ref,
                    *, eps, n_valid, ts):
    i = pl.program_id(0)
    n_tiles = pl.num_programs(0)
    S_pad = o_ref.shape[1]

    @pl.when(i == 0)
    def _():
        sum_ref[...] = jnp.zeros_like(sum_ref)

    y = jnp.dot(w_ref[...].astype(jnp.float32), x_ref[...].astype(jnp.float32),
                preferred_element_type=jnp.float32) + b_ref[...]        # [D, ts]

    # mask padded columns out of the batch statistics
    col = i * ts + jax.lax.broadcasted_iota(jnp.int32, (1, ts), 1)
    valid = (col < n_valid).astype(jnp.float32)                         # [1, ts]
    sum_ref[...] += jnp.sum(y * valid, axis=1, keepdims=True)

    start = pl.multiple_of(i * ts, 128)
    o_ref[:, pl.ds(start, ts)] = y                                       # cache in VMEM

    @pl.when(i == n_tiles - 1)
    def _():
        inv_n = 1.0 / n_valid
        mean = sum_ref[...] * inv_n                                      # [D, 1]
        cols = jax.lax.broadcasted_iota(jnp.int32, (1, S_pad), 1)
        vmask = (cols < n_valid).astype(jnp.float32)                     # [1, S_pad]
        d = (o_ref[...] - mean) * vmask
        var = jnp.sum(d * d, axis=1, keepdims=True) * inv_n              # centered, biased
        o_ref[...] = (g_ref[...] * (o_ref[...] - mean) * jax.lax.rsqrt(var + eps)
                      + bt_ref[...])


def pe_head_conv_bn(x_t, w_t, b, gamma, beta, n_valid, eps=1e-5):
    """x_t: [Cp, S_pad] bf16 ; w_t: [D, Cp] bf16 -> [D, S_pad] f32.
    Training-mode BN batch statistics over the n_valid real columns."""
    Cp, S_pad = x_t.shape
    D = w_t.shape[0]
    ts = _pick_spatial_tile(S_pad)
    nS = S_pad // ts

    return pl.pallas_call(
        functools.partial(_pe_head_kernel, eps=eps, n_valid=n_valid, ts=ts),
        out_shape=jax.ShapeDtypeStruct((D, S_pad), jnp.float32),
        grid_spec=pltpu.PrefetchScalarGridSpec(
            num_scalar_prefetch=0,
            grid=(nS,),
            in_specs=[pl.BlockSpec((Cp, ts), lambda i: (0, i)),
                      pl.BlockSpec((D, Cp), lambda i: (0, 0)),
                      pl.BlockSpec((D, 1), lambda i: (0, 0)),
                      pl.BlockSpec((D, 1), lambda i: (0, 0)),
                      pl.BlockSpec((D, 1), lambda i: (0, 0))],
            # full-extent output, constant index -> VMEM-resident accumulator,
            # single HBM writeback at the end.
            out_specs=pl.BlockSpec((D, S_pad), lambda i: (0, 0)),
            scratch_shapes=[pltpu.VMEM((D, 1), jnp.float32)],
        ),
        compiler_params=pltpu.CompilerParams(
            dimension_semantics=("arbitrary",),   # carries sum/output state
            vmem_limit_bytes=_VMEM_LIMIT),
    )(x_t, w_t, b, gamma, beta)


# --------------------------------------------------------------------------
# forward
# --------------------------------------------------------------------------
def distillation_backbone_forward(params, x, *, ds):
    B, V, C, H, W = x.shape
    assert V == 1, "forward() assumes V == 1 after the trunk (as in the reference)"
    BV = B * V
    Hs, Ws = H // ds, W // ds
    S = Hs * Ws
    S_pad = ((S + 127) // 128) * 128          # lane-pad: tiles always 128-multiples
    Z = params["w_feat"].shape[1]
    D = params["w_dino"].shape[1]

    rgbd = x.reshape(BV, C, H, W)

    # ---- depth completion trunk (input glue) -------------------------------
    # TODO(synk): the real DepthCompletion trunk is an external module not given
    # in this file; modeled as a ds-strided patch embed + linear heads.
    # Cast to bf16 BEFORE the space-to-depth so the materialized transposed
    # copy is half-width.  TODO(synk): fuse the ds x ds rearrangement into the
    # kernel (row-block BlockSpec over rgbd) to remove this pre-pass entirely.
    patches_t = rgbd.astype(jnp.bfloat16).reshape(BV, C, Hs, ds, Ws, ds)
    patches_t = patches_t.transpose(0, 1, 3, 5, 2, 4).reshape(BV, C * ds * ds, S)
    if S_pad != S:
        patches_t = jnp.pad(patches_t, ((0, 0), (0, 0), (0, S_pad - S)))

    # weight packing: heads concatenated [dino ; depth] so depth is one extra
    # sublane row of a single fused matmul (no N=1 matmul / masked stores).
    wf_t = params["w_feat"].T.astype(jnp.bfloat16)                      # [Z, K]
    bf = params["b_feat"].reshape(Z, 1).astype(jnp.float32)
    wh_t = jnp.concatenate([params["w_dino"].T, params["w_depth"].T],
                           axis=0).astype(jnp.bfloat16)                 # [D+1, Z]
    bh = jnp.concatenate([params["b_dino"], params["b_depth"]]
                         ).reshape(D + 1, 1).astype(jnp.float32)

    # ---- PE map: bilinear resize (plain XLA einsum) + pe_head kernel --------
    pe_map = params["learnable_pe_map"][0]                              # [Cp, ph, pw]
    Cp, ph, pw = pe_map.shape
    Lh = _bilinear_matrix(Hs, ph)                                       # [Hs, ph]
    Lw = _bilinear_matrix(Ws, pw)                                       # [Ws, pw]
    pe_resized_t = jnp.einsum('hp,cpq,wq->chw', Lh, pe_map, Lw).reshape(Cp, S)
    if S_pad != S:
        pe_resized_t = jnp.pad(pe_resized_t, ((0, 0), (0, S_pad - S)))

    # TODO(synk): BN uses per-call batch statistics (training-mode); eval-mode
    # running stats would need running_mean/var parameters.
    dino_pe_t = pe_head_conv_bn(
        pe_resized_t.astype(jnp.bfloat16),
        params["w_pe"].T.astype(jnp.bfloat16),
        params["b_pe"].reshape(D, 1).astype(jnp.float32),
        params["gamma_pe"].reshape(D, 1).astype(jnp.float32),
        params["beta_pe"].reshape(D, 1).astype(jnp.float32),
        n_valid=S)                                                      # [D, S_pad]

    # ---- fused trunk + depth head + dino head + PE add ----------------------
    # TODO(synk): the configured feature-head class is external; modeled as a
    # 1x1-conv projection fused into the same kernel.
    feats_t, dino_t, dinope_t, depth_t = fused_backbone_heads(
        patches_t, wf_t, bf, wh_t, bh, dino_pe_t)

    def _unpad(a):
        return a if S_pad == S else a[..., :S]

    V1 = 1  # forward() resets V = 1 after the trunk
    outputs = {
        # large feature streams are bf16 per the perf review; layouts are
        # already (N, C, Hs*Ws) -> NCHW via free reshapes.
        "depth_preds_feats": _unpad(feats_t).reshape(BV, Z, Hs, Ws),     # bf16
        "depth_preds_metric": _unpad(depth_t).reshape(BV, 1, Hs, Ws),    # f32
        "dino_pe": _unpad(dino_pe_t).reshape(1, D, Hs, Ws),              # f32
        "dino_pefree_feats": _unpad(dino_t).reshape(B, V1, D, Hs, Ws),   # bf16
        "dino_pe_feats": _unpad(dinope_t).reshape(B, V1, D, Hs, Ws),     # bf16
    }
    # TODO(synk): multiview_distillation / Camera2MapMulti scatter path not modeled (disabled).
    return outputs


# --------------------------------------------------------------------------
# main
# --------------------------------------------------------------------------
if __name__ == "__main__":
    key = jax.random.PRNGKey(0)
    B, V, C, H, W = 2, 1, 4, 16, 16          # input  [B, Tin, C, H, W]
    ds = 4                                   # effnet downsample -> Hs = Ws = 4
    Z = 32                                   # depth trunk feature channels
    D = 32                                   # fdn_embed_dim
    Cp = D // 2                              # learnable PE map channels
    ph = pw = 8                              # pe_map_cfg.height / width

    ks = jax.random.split(key, 6)
    params = {
        "w_feat": 0.02 * jax.random.normal(ks[0], (C * ds * ds, Z), jnp.float32),
        "b_feat": jnp.zeros((Z,), jnp.float32),
        "w_depth": 0.02 * jax.random.normal(ks[1], (Z, 1), jnp.float32),
        "b_depth": jnp.zeros((1,), jnp.float32),
        "w_dino": 0.02 * jax.random.normal(ks[2], (Z, D), jnp.float32),
        "b_dino": jnp.zeros((D,), jnp.float32),
        "learnable_pe_map": 0.05 * jax.random.normal(ks[3], (1, Cp, ph, pw), jnp.float32),
        "w_pe": 0.02 * jax.random.normal(ks[4], (Cp, D), jnp.float32),
        "b_pe": jnp.zeros((D,), jnp.float32),
        "gamma_pe": jnp.ones((D,), jnp.float32),
        "beta_pe": jnp.zeros((D,), jnp.float32),
    }

    x = jax.random.normal(ks[5], (B, V, C, H, W), jnp.float32)

    fwd = jax.jit(functools.partial(distillation_backbone_forward, ds=ds))
    outputs = fwd(params, x)
    jax.block_until_ready(outputs)

    # light shape sanity checks
    Hs, Ws = H // ds, W // ds
    assert outputs["depth_preds_feats"].shape == (B * V, Z, Hs, Ws)
    assert outputs["depth_preds_metric"].shape == (B * V, 1, Hs, Ws)
    assert outputs["dino_pe"].shape == (1, D, Hs, Ws)
    assert outputs["dino_pe_feats"].shape == (B, 1, D, Hs, Ws)
    assert outputs["dino_pefree_feats"].shape == (B, 1, D, Hs, Ws)
    # finite-ness sanity
    assert bool(jnp.isfinite(outputs["dino_pe_feats"].astype(jnp.float32)).all())
    assert bool(jnp.isfinite(outputs["depth_preds_feats"].astype(jnp.float32)).all())
    assert bool(jnp.isfinite(outputs["dino_pe"]).all())

    print("KERNEL_OK")
</pallas_src>

<mosaic_0001>
module attributes {stable_mosaic.version = 11 : i64} {
  func.func @_pe_head_kernel(%arg0: i32, %arg1: memref<16x128xbf16, #tpu.memory_space<vmem>>, %arg2: memref<32x16xbf16, #tpu.memory_space<vmem>>, %arg3: memref<32x1xf32, #tpu.memory_space<vmem>>, %arg4: memref<32x1xf32, #tpu.memory_space<vmem>>, %arg5: memref<32x1xf32, #tpu.memory_space<vmem>>, %arg6: memref<32x128xf32, #tpu.memory_space<vmem>>, %arg7: memref<32x1xf32, #tpu.memory_space<vmem>>) attributes {dimension_semantics = [#tpu.dimension_semantics<arbitrary>], iteration_bounds = array<i64: 1>, scalar_prefetch = 0 : i64, scratch_operands = 1 : i64, tpu.core_type = #tpu.core_type<tc>, window_params = [{transform_indices = @transform_0, window_bounds = array<i64: 16, 128>}, {pipeline_mode = #tpu.pipeline_mode<synchronous>, transform_indices = @transform_1, window_bounds = array<i64: 32, 16>}, {pipeline_mode = #tpu.pipeline_mode<synchronous>, transform_indices = @transform_2, window_bounds = array<i64: 32, 1>}, {pipeline_mode = #tpu.pipeline_mode<synchronous>, transform_indices = @transform_3, window_bounds = array<i64: 32, 1>}, {pipeline_mode = #tpu.pipeline_mode<synchronous>, transform_indices = @transform_4, window_bounds = array<i64: 32, 1>}, {pipeline_mode = #tpu.pipeline_mode<synchronous>, transform_indices = @transform_5, window_bounds = array<i64: 32, 128>}]} {
    %c0_i32 = arith.constant 0 : i32
    %0 = arith.cmpi eq, %arg0, %c0_i32 : i32
    %1 = arith.extui %0 : i1 to i32
    %c0_i32_0 = arith.constant 0 : i32
    %2 = arith.cmpi ne, %1, %c0_i32_0 : i32
    scf.if %2 {
      %cst_15 = arith.constant 0.000000e+00 : f32
      %33 = vector.broadcast %cst_15 : f32 to vector<32x1xf32>
      %c0_16 = arith.constant 0 : index
      %c0_17 = arith.constant 0 : index
      %34 = vector.load %arg7[%c0_16, %c0_17] : memref<32x1xf32, #tpu.memory_space<vmem>>, vector<32x1xf32>
      tpu.vector_store %arg7[%c0_16, %c0_17], %33 {strides = array<i32>} : memref<32x1xf32, #tpu.memory_space<vmem>>, vector<32x1xf32>,
    } else {
    }
    %c0 = arith.constant 0 : index
    %c0_1 = arith.constant 0 : index
    %3 = vector.load %arg2[%c0, %c0_1] : memref<32x16xbf16, #tpu.memory_space<vmem>>, vector<32x16xbf16>
    %4 = arith.extf %3 : vector<32x16xbf16> to vector<32x16xf32>
    %c0_2 = arith.constant 0 : index
    %c0_3 = arith.constant 0 : index
    %5 = vector.load %arg1[%c0_2, %c0_3] : memref<16x128xbf16, #tpu.memory_space<vmem>>, vector<16x128xbf16>
    %6 = arith.extf %5 : vector<16x128xbf16> to vector<16x128xf32>
    %cst = arith.constant dense<0.000000e+00> : vector<32x128xf32>
    %7 = tpu.matmul %4, %6, %cst {dimension_numbers = #tpu.dot_dimension_numbers<[1], [0], [0], [1], [0, 0, 1, 1], [], []>} : vector<32x16xf32>, vector<16x128xf32>, vector<32x128xf32> -> vector<32x128xf32>
    %c0_4 = arith.constant 0 : index
    %c0_5 = arith.constant 0 : index
    %8 = vector.load %arg3[%c0_4, %c0_5] : memref<32x1xf32, #tpu.memory_space<vmem>>, vector<32x1xf32>
    %9 = vector.broadcast %8 : vector<32x1xf32> to vector<32x128xf32>
    %10 = arith.addf %7, %9 : vector<32x128xf32>
    %c128_i32 = arith.constant 128 : i32
    %11 = arith.muli %arg0, %c128_i32 : i32
    %12 = tpu.iota {dimensions = array<i32: 1>} : vector<1x128xi32>
    %13 = vector.broadcast %11 : i32 to vector<1x128xi32>
    %14 = arith.addi %13, %12 : vector<1x128xi32>
    %c16_i32 = arith.constant 16 : i32
    %15 = vector.broadcast %c16_i32 : i32 to vector<1x128xi32>
    %16 = arith.cmpi slt, %14, %15 : vector<1x128xi32>
    %17 = arith.extui %16 : vector<1x128xi1> to vector<1x128xi32>
    %18 = arith.sitofp %17 : vector<1x128xi32> to vector<1x128xf32>
    %c0_6 = arith.constant 0 : index
    %c0_7 = arith.constant 0 : index
    %19 = vector.load %arg7[%c0_6, %c0_7] : memref<32x1xf32, #tpu.memory_space<vmem>>, vector<32x1xf32>
    %20 = vector.broadcast %18 : vector<1x128xf32> to vector<32x128xf32>
    %21 = arith.mulf %10, %20 : vector<32x128xf32>
    %cst_8 = arith.constant dense<0.000000e+00> : vector<32xf32>
    %22 = vector.multi_reduction <add>, %21, %cst_8 [1] : vector<32x128xf32> to vector<32xf32>
    %23 = vector.shape_cast %22 : vector<32xf32> to vector<32x1xf32>
    %24 = arith.addf %19, %23 : vector<32x1xf32>
    %c0_9 = arith.constant 0 : index
    %c0_10 = arith.constant 0 : index
    %25 = vector.load %arg7[%c0_9, %c0_10] : memref<32x1xf32, #tpu.memory_space<vmem>>, vector<32x1xf32>
    tpu.vector_store %arg7[%c0_9, %c0_10], %24 {strides = array<i32>} : memref<32x1xf32, #tpu.memory_space<vmem>>, vector<32x1xf32>,
    %c128_i32_11 = arith.constant 128 : i32
    %26 = arith.muli %arg0, %c128_i32_11 : i32
    %27 = tpu.assume_multiple %26, 128 : i32
    %c0_12 = arith.constant 0 : index
    %28 = arith.index_cast %27 : i32 to index
    %29 = vector.load %arg6[%c0_12, %28] : memref<32x128xf32, #tpu.memory_space<vmem>>, vector<32x128xf32>
    tpu.vector_store %arg6[%c0_12, %28], %10 {strides = array<i32>} : memref<32x128xf32, #tpu.memory_space<vmem>>, vector<32x128xf32>,
    %c0_i32_13 = arith.constant 0 : i32
    %30 = arith.cmpi eq, %arg0, %c0_i32_13 : i32
    %31 = arith.extui %30 : i1 to i32
    %c0_i32_14 = arith.constant 0 : i32
    %32 = arith.cmpi ne, %31, %c0_i32_14 : i32
    scf.if %32 {
      %c0_15 = arith.constant 0 : index
      %c0_16 = arith.constant 0 : index
      %33 = vector.load %arg7[%c0_15, %c0_16] : memref<32x1xf32, #tpu.memory_space<vmem>>, vector<32x1xf32>
      %cst_17 = arith.constant 6.250000e-02 : f32
      %34 = vector.broadcast %cst_17 : f32 to vector<32x1xf32>
      %35 = arith.mulf %33, %34 : vector<32x1xf32>
      %36 = tpu.iota {dimensions = array<i32: 1>} : vector<1x128xi32>
      %c16_i32_18 = arith.constant 16 : i32
      %37 = vector.broadcast %c16_i32_18 : i32 to vector<1x128xi32>
      %38 = arith.cmpi slt, %36, %37 : vector<1x128xi32>
      %39 = arith.extui %38 : vector<1x128xi1> to vector<1x128xi32>
      %40 = arith.sitofp %39 : vector<1x128xi32> to vector<1x128xf32>
      %c0_19 = arith.constant 0 : index
      %c0_20 = arith.constant 0 : index
      %41 = vector.load %arg6[%c0_19, %c0_20] : memref<32x128xf32, #tpu.memory_space<vmem>>, vector<32x128xf32>
      %42 = vector.broadcast %35 : vector<32x1xf32> to vector<32x128xf32>
      %43 = arith.subf %41, %42 : vector<32x128xf32>
      %44 = vector.broadcast %40 : vector<1x128xf32> to vector<32x128xf32>
      %45 = arith.mulf %43, %44 : vector<32x128xf32>
      %46 = arith.mulf %45, %45 : vector<32x128xf32>
      %cst_21 = arith.constant dense<0.000000e+00> : vector<32xf32>
      %47 = vector.multi_reduction <add>, %46, %cst_21 [1] : vector<32x128xf32> to vector<32xf32>
      %48 = vector.shape_cast %47 : vector<32xf32> to vector<32x1xf32>
      %cst_22 = arith.constant 6.250000e-02 : f32
      %49 = vector.broadcast %cst_22 : f32 to vector<32x1xf32>
      %50 = arith.mulf %48, %49 : vector<32x1xf32>
      %c0_23 = arith.constant 0 : index
      %c0_24 = arith.constant 0 : index
      %51 = vector.load %arg4[%c0_23, %c0_24] : memref<32x1xf32, #tpu.memory_space<vmem>>, vector<32x1xf32>
      %c0_25 = arith.constant 0 : index
      %c0_26 = arith.constant 0 : index
      %52 = vector.load %arg6[%c0_25, %c0_26] : memref<32x128xf32, #tpu.memory_space<vmem>>, vector<32x128xf32>
      %53 = vector.broadcast %35 : vector<32x1xf32> to vector<32x128xf32>
      %54 = arith.subf %52, %53 : vector<32x128xf32>
      %55 = vector.broadcast %51 : vector<32x1xf32> to vector<32x128xf32>
      %56 = arith.mulf %55, %54 : vector<32x128xf32>
      %cst_27 = arith.constant 9.99999974E-6 : f32
      %57 = vector.broadcast %cst_27 : f32 to vector<32x1xf32>
      %58 = arith.addf %50, %57 : vector<32x1xf32>
      %59 = math.rsqrt %58 : vector<32x1xf32>
      %60 = vector.broadcast %59 : vector<32x1xf32> to vector<32x128xf32>
      %61 = arith.mulf %56, %60 : vector<32x128xf32>
      %c0_28 = arith.constant 0 : index
      %c0_29 = arith.constant 0 : index
      %62 = vector.load %arg5[%c0_28, %c0_29] : memref<32x1xf32, #tpu.memory_space<vmem>>, vector<32x1xf32>
      %63 = vector.broadcast %62 : vector<32x1xf32> to vector<32x128xf32>
      %64 = arith.addf %61, %63 : vector<32x128xf32>
      %c0_30 = arith.constant 0 : index
      %c0_31 = arith.constant 0 : index
      %65 = vector.load %arg6[%c0_30, %c0_31] : memref<32x128xf32, #tpu.memory_space<vmem>>, vector<32x128xf32>
      tpu.vector_store %arg6[%c0_30, %c0_31], %64 {strides = array<i32>} : memref<32x128xf32, #tpu.memory_space<vmem>>, vector<32x128xf32>,
    } else {
    }
    return
  }
  func.func @transform_0(%arg0: i32) -> (i32, i32) {
    %c0_i32 = arith.constant 0 : i32
    %c0_i32_0 = arith.constant 0 : i32
    return %c0_i32, %arg0 : i32, i32
  }
  func.func @transform_1(%arg0: i32) -> (i32, i32) {
    %c0_i32 = arith.constant 0 : i32
    %c0_i32_0 = arith.constant 0 : i32
    %c0_i32_1 = arith.constant 0 : i32
    return %c0_i32, %c0_i32_0 : i32, i32
  }
  func.func @transform_2(%arg0: i32) -> (i32, i32) {
    %c0_i32 = arith.constant 0 : i32
    %c0_i32_0 = arith.constant 0 : i32
    %c0_i32_1 = arith.constant 0 : i32
    return %c0_i32, %c0_i32_0 : i32, i32
  }
  func.func @transform_3(%arg0: i32) -> (i32, i32) {
    %c0_i32 = arith.constant 0 : i32
    %c0_i32_0 = arith.constant 0 : i32
    %c0_i32_1 = arith.constant 0 : i32
    return %c0_i32, %c0_i32_0 : i32, i32
  }
  func.func @transform_4(%arg0: i32) -> (i32, i32) {
    %c0_i32 = arith.constant 0 : i32
    %c0_i32_0 = arith.constant 0 : i32
    %c0_i32_1 = arith.constant 0 : i32
    return %c0_i32, %c0_i32_0 : i32, i32
  }
  func.func @transform_5(%arg0: i32) -> (i32, i32) {
    %c0_i32 = arith.constant 0 : i32
    %c0_i32_0 = arith.constant 0 : i32
    %c0_i32_1 = arith.constant 0 : i32
    return %c0_i32, %c0_i32_0 : i32, i32
  }
}

module attributes {stable_mosaic.version = 11 : i64} {
  func.func @_fused_head_kernel(%arg0: i32, %arg1: memref<2x64x128xbf16, #tpu.memory_space<vmem>>, %arg2: memref<32x64xbf16, #tpu.memory_space<vmem>>, %arg3: memref<32x1xf32, #tpu.memory_space<vmem>>, %arg4: memref<33x32xbf16, #tpu.memory_space<vmem>>, %arg5: memref<33x1xf32, #tpu.memory_space<vmem>>, %arg6: memref<32x128xf32, #tpu.memory_space<vmem>>, %arg7: memref<2x32x128xbf16, #tpu.memory_space<vmem>>, %arg8: memref<2x32x128xbf16, #tpu.memory_space<vmem>>, %arg9: memref<2x32x128xbf16, #tpu.memory_space<vmem>>, %arg10: memref<2x1x128xf32, #tpu.memory_space<vmem>>) attributes {dimension_semantics = [#tpu.dimension_semantics<parallel>], iteration_bounds = array<i64: 1>, scalar_prefetch = 0 : i64, scratch_operands = 0 : i64, tpu.core_type = #tpu.core_type<tc>, window_params = [{transform_indices = @transform_0, window_bounds = array<i64: 2, 64, 128>}, {pipeline_mode = #tpu.pipeline_mode<synchronous>, transform_indices = @transform_1, window_bounds = array<i64: 32, 64>}, {pipeline_mode = #tpu.pipeline_mode<synchronous>, transform_indices = @transform_2, window_bounds = array<i64: 32, 1>}, {pipeline_mode = #tpu.pipeline_mode<synchronous>, transform_indices = @transform_3, window_bounds = array<i64: 33, 32>}, {pipeline_mode = #tpu.pipeline_mode<synchronous>, transform_indices = @transform_4, window_bounds = array<i64: 33, 1>}, {transform_indices = @transform_5, window_bounds = array<i64: 32, 128>}, {transform_indices = @transform_6, window_bounds = array<i64: 2, 32, 128>}, {transform_indices = @transform_7, window_bounds = array<i64: 2, 32, 128>}, {transform_indices = @transform_8, window_bounds = array<i64: 2, 32, 128>}, {transform_indices = @transform_9, window_bounds = array<i64: 2, 1, 128>}]} {
    %c0 = arith.constant 0 : index
    %c0_0 = arith.constant 0 : index
    %0 = vector.load %arg2[%c0, %c0_0] : memref<32x64xbf16, #tpu.memory_space<vmem>>, vector<32x64xbf16>
    %1 = arith.extf %0 : vector<32x64xbf16> to vector<32x64xf32>
    %c0_1 = arith.constant 0 : index
    %c0_2 = arith.constant 0 : index
    %2 = vector.load %arg4[%c0_1, %c0_2] : memref<33x32xbf16, #tpu.memory_space<vmem>>, vector<33x32xbf16>
    %3 = arith.extf %2 : vector<33x32xbf16> to vector<33x32xf32>
    %c0_3 = arith.constant 0 : index
    %c0_4 = arith.constant 0 : index
    %4 = vector.load %arg3[%c0_3, %c0_4] : memref<32x1xf32, #tpu.memory_space<vmem>>, vector<32x1xf32>
    %c0_5 = arith.constant 0 : index
    %c0_6 = arith.constant 0 : index
    %5 = vector.load %arg5[%c0_5, %c0_6] : memref<33x1xf32, #tpu.memory_space<vmem>>, vector<33x1xf32>
    %c0_7 = arith.constant 0 : index
    %c0_8 = arith.constant 0 : index
    %6 = vector.load %arg6[%c0_7, %c0_8] : memref<32x128xf32, #tpu.memory_space<vmem>>, vector<32x128xf32>
    %c0_9 = arith.constant 0 : index
    %c0_10 = arith.constant 0 : index
    %c0_11 = arith.constant 0 : index
    %7 = vector.load %arg1[%c0_9, %c0_10, %c0_11] : memref<2x64x128xbf16, #tpu.memory_space<vmem>>, vector<1x64x128xbf16>
    %8 = vector.shape_cast %7 : vector<1x64x128xbf16> to vector<64x128xbf16>
    %9 = arith.extf %8 : vector<64x128xbf16> to vector<64x128xf32>
    %cst = arith.constant dense<0.000000e+00> : vector<32x128xf32>
    %10 = tpu.matmul %1, %9, %cst {dimension_numbers = #tpu.dot_dimension_numbers<[1], [0], [0], [1], [0, 0, 1, 1], [], []>} : vector<32x64xf32>, vector<64x128xf32>, vector<32x128xf32> -> vector<32x128xf32>
    %11 = vector.broadcast %4 : vector<32x1xf32> to vector<32x128xf32>
    %12 = arith.addf %10, %11 : vector<32x128xf32>
    %cst_12 = arith.constant 0.000000e+00 : f32
    %13 = vector.broadcast %cst_12 : f32 to vector<32x128xf32>
    %14 = arith.maximumf %12, %13 : vector<32x128xf32>
    %15 = arith.truncf %14 : vector<32x128xf32> to vector<32x128xbf16>
    %c0_13 = arith.constant 0 : index
    %c0_14 = arith.constant 0 : index
    %c0_15 = arith.constant 0 : index
    %16 = vector.load %arg7[%c0_13, %c0_14, %c0_15] : memref<2x32x128xbf16, #tpu.memory_space<vmem>>, vector<1x32x128xbf16>
    %17 = vector.shape_cast %16 : vector<1x32x128xbf16> to vector<32x128xbf16>
    %18 = vector.shape_cast %15 : vector<32x128xbf16> to vector<1x32x128xbf16>
    tpu.vector_store %arg7[%c0_13, %c0_14, %c0_15], %18 {strides = array<i32>} : memref<2x32x128xbf16, #tpu.memory_space<vmem>>, vector<1x32x128xbf16>,
    %cst_16 = arith.constant dense<0.000000e+00> : vector<33x128xf32>
    %19 = tpu.matmul %3, %14, %cst_16 {dimension_numbers = #tpu.dot_dimension_numbers<[1], [0], [0], [1], [0, 0, 1, 1], [], []>} : vector<33x32xf32>, vector<32x128xf32>, vector<33x128xf32> -> vector<33x128xf32>
    %20 = vector.broadcast %5 : vector<33x1xf32> to vector<33x128xf32>
    %21 = arith.addf %19, %20 : vector<33x128xf32>
    %22 = vector.extract_strided_slice %21 {offsets = [0, 0], sizes = [32, 128], strides = [1, 1]} : vector<33x128xf32> to vector<32x128xf32>
    %23 = arith.truncf %22 : vector<32x128xf32> to vector<32x128xbf16>
    %c0_17 = arith.constant 0 : index
    %c0_18 = arith.constant 0 : index
    %c0_19 = arith.constant 0 : index
    %24 = vector.load %arg8[%c0_17, %c0_18, %c0_19] : memref<2x32x128xbf16, #tpu.memory_space<vmem>>, vector<1x32x128xbf16>
    %25 = vector.shape_cast %24 : vector<1x32x128xbf16> to vector<32x128xbf16>
    %26 = vector.shape_cast %23 : vector<32x128xbf16> to vector<1x32x128xbf16>
    tpu.vector_store %arg8[%c0_17, %c0_18, %c0_19], %26 {strides = array<i32>} : memref<2x32x128xbf16, #tpu.memory_space<vmem>>, vector<1x32x128xbf16>,
    %27 = arith.addf %22, %6 : vector<32x128xf32>
    %28 = arith.truncf %27 : vector<32x128xf32> to vector<32x128xbf16>
    %c0_20 = arith.constant 0 : index
    %c0_21 = arith.constant 0 : index
    %c0_22 = arith.constant 0 : index
    %29 = vector.load %arg9[%c0_20, %c0_21, %c0_22] : memref<2x32x128xbf16, #tpu.memory_space<vmem>>, vector<1x32x128xbf16>
    %30 = vector.shape_cast %29 : vector<1x32x128xbf16> to vector<32x128xbf16>
    %31 = vector.shape_cast %28 : vector<32x128xbf16> to vector<1x32x128xbf16>
    tpu.vector_store %arg9[%c0_20, %c0_21, %c0_22], %31 {strides = array<i32>} : memref<2x32x128xbf16, #tpu.memory_space<vmem>>, vector<1x32x128xbf16>,
    %32 = vector.extract_strided_slice %21 {offsets = [32, 0], sizes = [1, 128], strides = [1, 1]} : vector<33x128xf32> to vector<1x128xf32>
    %cst_23 = arith.constant 0.000000e+00 : f32
    %33 = vector.broadcast %cst_23 : f32 to vector<1x128xf32>
    %34 = arith.maximumf %32, %33 : vector<1x128xf32>
    %c0_24 = arith.constant 0 : index
    %c0_25 = arith.constant 0 : index
    %c0_26 = arith.constant 0 : index
    %35 = vector.load %arg10[%c0_24, %c0_25, %c0_26] : memref<2x1x128xf32, #tpu.memory_space<vmem>>, vector<1x1x128xf32>
    %36 = vector.shape_cast %35 : vector<1x1x128xf32> to vector<1x128xf32>
    %37 = vector.shape_cast %34 : vector<1x128xf32> to vector<1x1x128xf32>
    tpu.vector_store %arg10[%c0_24, %c0_25, %c0_26], %37 {strides = array<i32>} : memref<2x1x128xf32, #tpu.memory_space<vmem>>, vector<1x1x128xf32>,
    %c1 = arith.constant 1 : index
    %c0_27 = arith.constant 0 : index
    %c0_28 = arith.constant 0 : index
    %38 = vector.load %arg1[%c1, %c0_27, %c0_28] : memref<2x64x128xbf16, #tpu.memory_space<vmem>>, vector<1x64x128xbf16>
    %39 = vector.shape_cast %38 : vector<1x64x128xbf16> to vector<64x128xbf16>
    %40 = arith.extf %39 : vector<64x128xbf16> to vector<64x128xf32>
    %cst_29 = arith.constant dense<0.000000e+00> : vector<32x128xf32>
    %41 = tpu.matmul %1, %40, %cst_29 {dimension_numbers = #tpu.dot_dimension_numbers<[1], [0], [0], [1], [0, 0, 1, 1], [], []>} : vector<32x64xf32>, vector<64x128xf32>, vector<32x128xf32> -> vector<32x128xf32>
    %42 = vector.broadcast %4 : vector<32x1xf32> to vector<32x128xf32>
    %43 = arith.addf %41, %42 : vector<32x128xf32>
    %cst_30 = arith.constant 0.000000e+00 : f32
    %44 = vector.broadcast %cst_30 : f32 to vector<32x128xf32>
    %45 = arith.maximumf %43, %44 : vector<32x128xf32>
    %46 = arith.truncf %45 : vector<32x128xf32> to vector<32x128xbf16>
    %c1_31 = arith.constant 1 : index
    %c0_32 = arith.constant 0 : index
    %c0_33 = arith.constant 0 : index
    %47 = vector.load %arg7[%c1_31, %c0_32, %c0_33] : memref<2x32x128xbf16, #tpu.memory_space<vmem>>, vector<1x32x128xbf16>
    %48 = vector.shape_cast %47 : vector<1x32x128xbf16> to vector<32x128xbf16>
    %49 = vector.shape_cast %46 : vector<32x128xbf16> to vector<1x32x128xbf16>
    tpu.vector_store %arg7[%c1_31, %c0_32, %c0_33], %49 {strides = array<i32>} : memref<2x32x128xbf16, #tpu.memory_space<vmem>>, vector<1x32x128xbf16>,
    %cst_34 = arith.constant dense<0.000000e+00> : vector<33x128xf32>
    %50 = tpu.matmul %3, %45, %cst_34 {dimension_numbers = #tpu.dot_dimension_numbers<[1], [0], [0], [1], [0, 0, 1, 1], [], []>} : vector<33x32xf32>, vector<32x128xf32>, vector<33x128xf32> -> vector<33x128xf32>
    %51 = vector.broadcast %5 : vector<33x1xf32> to vector<33x128xf32>
    %52 = arith.addf %50, %51 : vector<33x128xf32>
    %53 = vector.extract_strided_slice %52 {offsets = [0, 0], sizes = [32, 128], strides = [1, 1]} : vector<33x128xf32> to vector<32x128xf32>
    %54 = arith.truncf %53 : vector<32x128xf32> to vector<32x128xbf16>
    %c1_35 = arith.constant 1 : index
    %c0_36 = arith.constant 0 : index
    %c0_37 = arith.constant 0 : index
    %55 = vector.load %arg8[%c1_35, %c0_36, %c0_37] : memref<2x32x128xbf16, #tpu.memory_space<vmem>>, vector<1x32x128xbf16>
    %56 = vector.shape_cast %55 : vector<1x32x128xbf16> to vector<32x128xbf16>
    %57 = vector.shape_cast %54 : vector<32x128xbf16> to vector<1x32x128xbf16>
    tpu.vector_store %arg8[%c1_35, %c0_36, %c0_37], %57 {strides = array<i32>} : memref<2x32x128xbf16, #tpu.memory_space<vmem>>, vector<1x32x128xbf16>,
    %58 = arith.addf %53, %6 : vector<32x128xf32>
    %59 = arith.truncf %58 : vector<32x128xf32> to vector<32x128xbf16>
    %c1_38 = arith.constant 1 : index
    %c0_39 = arith.constant 0 : index
    %c0_40 = arith.constant 0 : index
    %60 = vector.load %arg9[%c1_38, %c0_39, %c0_40] : memref<2x32x128xbf16, #tpu.memory_space<vmem>>, vector<1x32x128xbf16>
    %61 = vector.shape_cast %60 : vector<1x32x128xbf16> to vector<32x128xbf16>
    %62 = vector.shape_cast %59 : vector<32x128xbf16> to vector<1x32x128xbf16>
    tpu.vector_store %arg9[%c1_38, %c0_39, %c0_40], %62 {strides = array<i32>} : memref<2x32x128xbf16, #tpu.memory_space<vmem>>, vector<1x32x128xbf16>,
    %63 = vector.extract_strided_slice %52 {offsets = [32, 0], sizes = [1, 128], strides = [1, 1]} : vector<33x128xf32> to vector<1x128xf32>
    %cst_41 = arith.constant 0.000000e+00 : f32
    %64 = vector.broadcast %cst_41 : f32 to vector<1x128xf32>
    %65 = arith.maximumf %63, %64 : vector<1x128xf32>
    %c1_42 = arith.constant 1 : index
    %c0_43 = arith.constant 0 : index
    %c0_44 = arith.constant 0 : index
    %66 = vector.load %arg10[%c1_42, %c0_43, %c0_44] : memref<2x1x128xf32, #tpu.memory_space<vmem>>, vector<1x1x128xf32>
    %67 = vector.shape_cast %66 : vector<1x1x128xf32> to vector<1x128xf32>
    %68 = vector.shape_cast %65 : vector<1x128xf32> to vector<1x1x128xf32>
    tpu.vector_store %arg10[%c1_42, %c0_43, %c0_44], %68 {strides = array<i32>} : memref<2x1x128xf32, #tpu.memory_space<vmem>>, vector<1x1x128xf32>,
    return
  }
  func.func @transform_0(%arg0: i32) -> (i32, i32, i32) {
    %c0_i32 = arith.constant 0 : i32
    %c0_i32_0 = arith.constant 0 : i32
    %c0_i32_1 = arith.constant 0 : i32
    return %c0_i32, %c0_i32_0, %arg0 : i32, i32, i32
  }
  func.func @transform_1(%arg0: i32) -> (i32, i32) {
    %c0_i32 = arith.constant 0 : i32
    %c0_i32_0 = arith.constant 0 : i32
    %c0_i32_1 = arith.constant 0 : i32
    return %c0_i32, %c0_i32_0 : i32, i32
  }
  func.func @transform_2(%arg0: i32) -> (i32, i32) {
    %c0_i32 = arith.constant 0 : i32
    %c0_i32_0 = arith.constant 0 : i32
    %c0_i32_1 = arith.constant 0 : i32
    return %c0_i32, %c0_i32_0 : i32, i32
  }
  func.func @transform_3(%arg0: i32) -> (i32, i32) {
    %c0_i32 = arith.constant 0 : i32
    %c0_i32_0 = arith.constant 0 : i32
    %c0_i32_1 = arith.constant 0 : i32
    return %c0_i32, %c0_i32_0 : i32, i32
  }
  func.func @transform_4(%arg0: i32) -> (i32, i32) {
    %c0_i32 = arith.constant 0 : i32
    %c0_i32_0 = arith.constant 0 : i32
    %c0_i32_1 = arith.constant 0 : i32
    return %c0_i32, %c0_i32_0 : i32, i32
  }
  func.func @transform_5(%arg0: i32) -> (i32, i32) {
    %c0_i32 = arith.constant 0 : i32
    %c0_i32_0 = arith.constant 0 : i32
    return %c0_i32, %arg0 : i32, i32
  }
  func.func @transform_6(%arg0: i32) -> (i32, i32, i32) {
    %c0_i32 = arith.constant 0 : i32
    %c0_i32_0 = arith.constant 0 : i32
    %c0_i32_1 = arith.constant 0 : i32
    return %c0_i32, %c0_i32_0, %arg0 : i32, i32, i32
  }
  func.func @transform_7(%arg0: i32) -> (i32, i32, i32) {
    %c0_i32 = arith.constant 0 : i32
    %c0_i32_0 = arith.constant 0 : i32
    %c0_i32_1 = arith.constant 0 : i32
    return %c0_i32, %c0_i32_0, %arg0 : i32, i32, i32
  }
  func.func @transform_8(%arg0: i32) -> (i32, i32, i32) {
    %c0_i32 = arith.constant 0 : i32
    %c0_i32_0 = arith.constant 0 : i32
    %c0_i32_1 = arith.constant 0 : i32
    return %c0_i32, %c0_i32_0, %arg0 : i32, i32, i32
  }
  func.func @transform_9(%arg0: i32) -> (i32, i32, i32) {
    %c0_i32 = arith.constant 0 : i32
    %c0_i32_0 = arith.constant 0 : i32
    %c0_i32_1 = arith.constant 0 : i32
    return %c0_i32, %c0_i32_0, %arg0 : i32, i32, i32
  }
}

</mosaic_0001>

<bundles_post_ra>
// kernel: distillation_backbone_forward.2
= control target key start
LH: loop header
LB: loop body
LE: loop exit
PB: predicated region body
PF: predicated region fallthrough
CT: control target
= control target key end

     0   :  { %vm65_vm0 = vcmask 130048   ;;  %v395_v3 = vmov 0   ;;  %vm24_vm1 = vcmask 7168   ;;  %v396_v12 = vmov 0.0   ;;  %s510_s0 = inlined_call_operand.vmem [shape: bf16[16,128], index: 0, kind: input, shape index: {}]   ;;  %s511_s1 = inlined_call_operand.vmem [shape: bf16[32,16], index: 1, kind: input, shape index: {}]   ;;  %s512_s2 = inlined_call_operand.vmem [shape: f32[32,1], index: 2, kind: input, shape index: {}]   ;;  %s513_s3 = inlined_call_operand.vmem [shape: f32[32,1], index: 3, kind: input, shape index: {}]   ;;  %s514_s4 = inlined_call_operand.vmem [shape: f32[32,1], index: 4, kind: input, shape index: {}]   ;;  %s515_s5 = inlined_call_operand.vmem [shape: f32[32,128], index: 5, kind: output, shape index: {}]  }
   0x1   :  { %v357_v0 = vld [vmem:[%s510_s0] sm:$0xff]   ;;  %v360_v2 = vld [vmem:[%s511_s1 + $0x8] sm:$0xff]   ;;  %385 = vset.pattern.permute.xlu0 %v395_v3  ;;  %386 = vset.pattern.permute.xlu1 %v395_v3  ;;  %v43_v9 = vld [vmem:[%s512_s2 + $0x10] sm:$0xff]  ;;  %26 = vst.msk [vmem:[#allocation2 + $0x8] sm:$0xff] %vm24_vm1, %v396_v12  ;;  %v164_v13 = vlaneseq }
   0x2   :  { %v349_v1 = vld [vmem:[%s511_s1] sm:$0xff]   ;;  %378 = vmatprep.subr.bf16.mxu0 %v357_v0  ;;  %381 = vmatprep.subr.bf16.mxu1 %v357_v0  ;;  %v354_v6 = vunpack.c.l.bf16 %v360_v2  ;;  %v355_v7 = vunpack.c.h.bf16 %v360_v2  ;;  %v42_v10 = vld [vmem:[%s512_s2 + $0x8] sm:$0xff]  ;;  %v44_v11 = vld [vmem:[%s512_s2 + $0x18] sm:$0xff]  ;;  %25 = vst.msk [vmem:[#allocation2] sm:$0xff] %vm24_vm1, %v396_v12 }
   0x3   :  { %v350_v4 = vunpack.c.l.bf16 %v349_v1  ;;  %v351_v5 = vunpack.c.h.bf16 %v349_v1  ;;  %v41_v8 = vld [vmem:[%s512_s2] sm:$0xff]  ;;  %380 = vmatpush3.bf16.msra.mxu0 %v357_v0  ;;  %382 = vmatpush3.bf16.msra.mxu1 %v357_v0  ;;  %27 = vst.msk [vmem:[#allocation2 + $0x10] sm:$0xff] %vm24_vm1, %v396_v12  ;;  %28 = vst.msk [vmem:[#allocation2 + $0x18] sm:$0xff] %vm24_vm1, %v396_v12  ;;  %v165_v15 = vand.u32 127, %v164_v13  ;;  %v266_v48 = vld [vmem:[%s513_s3 + $0x8] sm:$0xff] }
   0x4   :  { %374 = vmatprep.mubr.msk.f32.mxu1 %vm65_vm0, %v354_v6  ;;  %47 = vperm.xlu0 %385, %v41_v8   ;;  %v305_v51 = vld [vmem:[%s514_s4] sm:$0xff]  ;;  %v267_v55 = vld [vmem:[%s513_s3 + $0x10] sm:$0xff]  ;;  %v268_v56 = vld [vmem:[%s513_s3 + $0x18] sm:$0xff] }
   0x5   :  { %371 = vmatprep.mubr.msk.f32.mxu0 %vm65_vm0, %v350_v4  ;;  %57 = vperm.xlu1 %386, %v43_v9   ;;  %vm168_vm2 = vcmp.lt.s32.totalorder %v165_v15, 16  ;;  %v265_v54 = vld [vmem:[%s513_s3] sm:$0xff]  ;;  %v306_v57 = vld [vmem:[%s514_s4 + $0x8] sm:$0xff]  ;;  %v308_v9 = vld [vmem:[%s514_s4 + $0x18] sm:$0xff] }
   0x6   :  { %372 = vmatmul.mubr.msk.f32.vlgmr.msra.gmra.mrb[0].mxu0 %vm65_vm0, %v351_v5  ;;  %375 = vmatmul.mubr.msk.f32.vlgmr.msra.gmra.mrb[0].mxu1 %vm65_vm0, %v355_v7  ;;  %v456_v20 = vsel %vm168_vm2, 1.0, %v396_v12 }
   0x8   :  { %52 = vperm.xlu0 %385, %v42_v10   ;;  %v172_v32 = vld [vmem:[#allocation2 + $0x8] sm:$0xff] }
   0x9   :  { %62 = vperm.xlu1 %386, %v44_v11   ;;  %v171_v33 = vld [vmem:[#allocation2] sm:$0xff]  ;;  %v307_v11 = vld [vmem:[%s514_s4 + $0x10] sm:$0xff] }
   0xa   :  { %v173_v38 = vld [vmem:[#allocation2 + $0x10] sm:$0xff]  ;;  %v174_v41 = vld [vmem:[#allocation2 + $0x18] sm:$0xff] }
  0x83   :  { %v48_v14 = vpop.permute.xlu0 %47 }
  0x84   :  { %v58_v17 = vpop.permute.xlu1 %57 }
  0x87   :  { %v53_v16 = vpop.permute.xlu0 %52 }
  0x88   :  { %v63_v28 = vpop.permute.xlu1 %62 }
  0xd9   :  { %v373_v18 = vpop.f32.mrb[0].mxu0  ;;  %v376_v19 = vpop.f32.mrb[0].mxu1 }
  0xda   :  { %v150_v21 = vadd.f32 %v373_v18, %v53_v16  ;;  %v144_v22 = vpop.f32.mrb[1].mxu0  ;;  %v154_v23 = vpop.f32.mrb[1].mxu1  ;;  %v160_v30 = vadd.f32 %v376_v19, %v63_v28 }
  0xdb   :  { %v145_v24 = vadd.f32 %v144_v22, %v48_v14  ;;  %v458_v25 = vadd.f32 %v154_v23, %v58_v17 }
  0xdc   :  { %v176_v26 = vmul.f32 %v456_v20, %v150_v21  ;;  %v178_v31 = vmul.f32 %v456_v20, %v160_v30 }
  0xdd   :  { %v175_v27 = vmul.f32 %v456_v20, %v145_v24  ;;  %v177_v29 = vmul.f32 %v456_v20, %v458_v25 }
  0xde   :  { %181 = vadd.xlane.f32.xlu1 %v176_v26 }
  0xdf   :  { %179 = vadd.xlane.f32.xlu0 %v175_v27 }
  0xe3   :  { %183 = vadd.xlane.f32.xlu0 %v177_v29 }
  0xe7   :  { %185 = vadd.xlane.f32.xlu0 %v178_v31 }
 0x16b   :  { %v182_v34 = vpop.xlane.xlu1 %181 }
 0x16c   :  { %v188_v35 = vadd.f32 %v182_v34, %v172_v32  ;;  %v180_v36 = vpop.xlane.xlu0 %179 }
 0x16d   :  { %v187_v37 = vadd.f32 %v180_v36, %v171_v33 }
 0x16e   :  { %193 = vst.msk [vmem:[#allocation2 + $0x8] sm:$0xff] %vm24_vm1, %v188_v35 }
 0x16f   :  { %192 = vst.msk [vmem:[#allocation2] sm:$0xff] %vm24_vm1, %v187_v37 }
 0x170   :  { %v184_v39 = vpop.xlane.xlu0 %183 }
 0x171   :  { %v189_v40 = vadd.f32 %v184_v39, %v173_v38 }
 0x173   :  { %194 = vst.msk [vmem:[#allocation2 + $0x10] sm:$0xff] %vm24_vm1, %v189_v40 }
 0x174   :  { %v186_v42 = vpop.xlane.xlu0 %185 }
 0x175   :  { %v190_v43 = vadd.f32 %v186_v42, %v174_v41  ;;  %v207_v44 = vld [vmem:[#allocation2 + $0x8] sm:$0xff] }
 0x176   :  { %v211_v45 = vmul.f32 0.0625, %v207_v44  ;;  %v206_v46 = vld [vmem:[#allocation2] sm:$0xff] }
 0x177   :  { %195 = vst.msk [vmem:[#allocation2 + $0x18] sm:$0xff] %vm24_vm1, %v190_v43  ;;  %v210_v47 = vmul.f32 0.0625, %v206_v46 }
 0x178   :  { %228 = vperm.xlu0 %385, %v211_v45  }
 0x179   :  { %223 = vperm.xlu1 %386, %v210_v47  }
 0x17a   :  { %v208_v49 = vld [vmem:[#allocation2 + $0x10] sm:$0xff] }
 0x17b   :  { %v212_v50 = vmul.f32 0.0625, %v208_v49 }
 0x17c   :  { %276 = vperm.xlu0 %385, %v266_v48  }
 0x17d   :  { %233 = vperm.xlu1 %386, %v212_v50  }
 0x17e   :  { %v209_v52 = vld [vmem:[#allocation2 + $0x18] sm:$0xff] }
 0x17f   :  { %v213_v53 = vmul.f32 0.0625, %v209_v52 }
 0x180   :  { %311 = vperm.xlu0 %385, %v305_v51  }
 0x181   :  { %238 = vperm.xlu1 %386, %v213_v53  }
 0x185   :  { %271 = vperm.xlu1 %386, %v265_v54  }
 0x189   :  { %281 = vperm.xlu1 %386, %v267_v55  }
 0x18d   :  { %286 = vperm.xlu1 %386, %v268_v56  }
 0x191   :  { %316 = vperm.xlu1 %386, %v306_v57  }
 0x1f7   :  { %v229_v58 = vpop.permute.xlu0 %228 }
 0x1f8   :  { %v242_v59 = vsub.f32 %v150_v21, %v229_v58  ;;  %v224_v60 = vpop.permute.xlu1 %223 }
 0x1f9   :  { %v241_v1 = vsub.f32 %v145_v24, %v224_v60 }
 0x1fa   :  { %v246_v61 = vmul.f32 %v456_v20, %v242_v59 }
 0x1fb   :  { %v245_v6 = vmul.f32 %v456_v20, %v241_v1  ;;  %v277_v16 = vpop.permute.xlu0 %276 }
 0x1fc   :  { %v234_v62 = vpop.permute.xlu1 %233  ;;  %v250_v63 = vmul.f32 %v246_v61, %v246_v61 }
 0x1fd   :  { %v243_v4 = vsub.f32 %v458_v25, %v234_v62  ;;  %v249_v7 = vmul.f32 %v245_v6, %v245_v6  ;;  %v290_v25 = vmul.f32 %v277_v16, %v242_v59 }
 0x1fe   :  { %255 = vadd.xlane.f32.xlu1 %v250_v63 }
 0x1ff   :  { %v247_v8 = vmul.f32 %v456_v20, %v243_v4 }
 0x200   :  { %v239_v0 = vpop.permute.xlu1 %238 }
 0x201   :  { %v244_v2 = vsub.f32 %v160_v30, %v239_v0  ;;  %v251_v10 = vmul.f32 %v247_v8, %v247_v8 }
 0x203   :  { %v248_v3 = vmul.f32 %v456_v20, %v244_v2  ;;  %v312_v20 = vpop.permute.xlu0 %311 }
 0x204   :  { %v272_v12 = vpop.permute.xlu1 %271 }
 0x205   :  { %v252_v5 = vmul.f32 %v248_v3, %v248_v3  ;;  %v289_v38 = vmul.f32 %v272_v12, %v241_v1 }
 0x207   :  { %259 = vadd.xlane.f32.xlu0 %v252_v5 }
 0x208   :  { %v282_v13 = vpop.permute.xlu1 %281 }
 0x209   :  { %v291_v42 = vmul.f32 %v282_v13, %v243_v4 }
 0x20b   :  { %253 = vadd.xlane.f32.xlu0 %v249_v7 }
 0x20c   :  { %v287_v14 = vpop.permute.xlu1 %286 }
 0x20d   :  { %v292_v34 = vmul.f32 %v287_v14, %v244_v2 }
 0x20f   :  { %257 = vadd.xlane.f32.xlu0 %v251_v10  ;;  %326 = vperm.xlu1 %386, %v308_v9  }
 0x210   :  { %v317_v15 = vpop.permute.xlu1 %316 }
 0x225   :  { %321 = vperm.xlu0 %385, %v307_v11  }
 0x28b   :  { %v256_v17 = vpop.xlane.xlu1 %255 }
 0x28c   :  { %v262_v18 = vmul.f32 0.0625, %v256_v17 }
 0x28e   :  { %v294_v19 = vadd.f32 1e-05, %v262_v18 }
 0x28f   :  { %v327_v37 = vpop.permute.xlu1 %326 }
 0x290   :  { %387 = vrsqrt.f32 %v294_v19 }
 0x294   :  { %v260_v21 = vpop.xlane.xlu0 %259 }
 0x295   :  { %v264_v22 = vmul.f32 0.0625, %v260_v21 }
 0x297   :  { %v296_v23 = vadd.f32 1e-05, %v264_v22 }
 0x298   :  { %v254_v24 = vpop.xlane.xlu0 %253 }
 0x299   :  { %389 = vrsqrt.f32 %v296_v23  ;;  %v261_v26 = vmul.f32 0.0625, %v254_v24 }
 0x29a   :  { %v388_v27 = vpop.eup %387 }
 0x29b   :  { %v302_v28 = vmul.f32 %v388_v27, %v290_v25  ;;  %v293_v29 = vadd.f32 1e-05, %v261_v26 }
 0x29c   :  { %v258_v30 = vpop.xlane.xlu0 %257 }
 0x29d   :  { %v330_v31 = vadd.f32 %v317_v15, %v302_v28  ;;  %391 = vrsqrt.f32 %v293_v29  ;;  %v263_v32 = vmul.f32 0.0625, %v258_v30 }
 0x29f   :  { %334 = vst [vmem:[%s515_s5 + $0x8] sm:$0xff] %v330_v31  ;;  %v295_v33 = vadd.f32 1e-05, %v263_v32 }
 0x2a1   :  { %393 = vrsqrt.f32 %v295_v33 }
 0x2a3   :  { %v390_v35 = vpop.eup %389 }
 0x2a4   :  { %v304_v36 = vmul.f32 %v390_v35, %v292_v34  ;;  %v322_v46 = vpop.permute.xlu0 %321 }
 0x2a6   :  { %v332_v39 = vadd.f32 %v327_v37, %v304_v36 }
 0x2a7   :  { %v392_v40 = vpop.eup %391 }
 0x2a8   :  { %336 = vst [vmem:[%s515_s5 + $0x18] sm:$0xff] %v332_v39  ;;  %v301_v41 = vmul.f32 %v392_v40, %v289_v38 }
 0x2aa   :  { %v329_v43 = vadd.f32 %v312_v20, %v301_v41 }
 0x2ab   :  { %v394_v44 = vpop.eup %393 }
 0x2ac   :  { %333 = vst [vmem:[%s515_s5] sm:$0xff] %v329_v43  ;;  %v303_v45 = vmul.f32 %v394_v44, %v291_v42 }
 0x2ae   :  { %v331_v47 = vadd.f32 %v322_v46, %v303_v45 }
 0x2b0   :  { %335 = vst [vmem:[%s515_s5 + $0x10] sm:$0xff] %v331_v47 }

// kernel: distillation_backbone_forward.3
= control target key start
LH: loop header
LB: loop body
LE: loop exit
PB: predicated region body
PF: predicated region fallthrough
CT: control target
= control target key end

     0   :  { %v1074_v2 = vmov 0   ;;  %vm94_vm0 = vcmask 523264   ;;  %v1075_v20 = vmov 0.0|0.0   ;;  %vm1076_vm1 = vmmov 0   ;;  %s1395_s0 = inlined_call_operand.vmem [shape: bf16[2,64,128], index: 0, kind: input, shape index: {}]   ;;  %s1396_s1 = inlined_call_operand.vmem [shape: bf16[32,64], index: 1, kind: input, shape index: {}]   ;;  %s1397_s2 = inlined_call_operand.vmem [shape: f32[32,1], index: 2, kind: input, shape index: {}]   ;;  %s1398_s4 = inlined_call_operand.vmem [shape: f32[33,1], index: 4, kind: input, shape index: {}]   ;;  %s1399_s6 = inlined_call_operand.vmem [shape: bf16[2,32,128], index: 6, kind: output, shape index: {0}]   ;;  %s1400_s3 = inlined_call_operand.vmem [shape: bf16[33,32], index: 3, kind: input, shape index: {}]   ;;  %s1401_s5 = inlined_call_operand.vmem [shape: f32[32,128], index: 5, kind: input, shape index: {}]   ;;  %s1402_s7 = inlined_call_operand.vmem [shape: bf16[2,32,128], index: 7, kind: output, shape index: {1}]   ;;  %s1403_s8 = inlined_call_operand.vmem [shape: bf16[2,32,128], index: 8, kind: output, shape index: {2}]   ;;  %s1404_s9 = inlined_call_operand.vmem [shape: f32[2,1,128], index: 9, kind: output, shape index: {3}]  }
   0x1   :  { %v779_v0 = vld [vmem:[%s1395_s0] sm:$0xff]   ;;  %v872_v1 = vld [vmem:[%s1395_s0 + $0x8] sm:$0xff]   ;;  %1072 = vset.pattern.permute.xlu0 %v1074_v2  ;;  %1073 = vset.pattern.permute.xlu1 %v1074_v2  ;;  %v47_v6 = vld [vmem:[%s1397_s2 + $0x10] sm:$0xff]  ;;  %v1077_v21 = vmov 0.0   ;;  %vm241_vm2 = vcmask 261120  }
   0x2   :  { %1021 = vmatprep.subr.bf16.mxu0 %v779_v0  ;;  %v1137_v3 = vld [vmem:[%s1396_s1] sm:$0xff]   ;;  %v873_v7 = vld [vmem:[%s1395_s0 + $0x10] sm:$0xff]   ;;  %v46_v8 = vld [vmem:[%s1397_s2 + $0x8] sm:$0xff]  ;;  %86 = vperm.xlu1 %1073, %v47_v6  }
   0x3   :  { %1023 = vmatpush3.bf16.msra.mxu0 %v779_v0  ;;  %v764_v4 = vunpack.c.l.bf16 %v1137_v3  ;;  %v45_v5 = vld [vmem:[%s1397_s2] sm:$0xff]  ;;  %v48_v9 = vld [vmem:[%s1397_s2 + $0x18] sm:$0xff]  ;;  %v50_v12 = vld [vmem:[%s1398_s4 + $0x8] sm:$0xff]  ;;  %v765_v15 = vunpack.c.h.bf16 %v1137_v3  ;;  %1036 = vmatprep.subr.bf16.mxu1 %v1075_v20 }
   0x4   :  { %1025 = vmatprep.subr.bf16.mxu0 %v872_v1  ;;  %76 = vperm.xlu0 %1072, %v45_v5   ;;  %v874_v10 = vld [vmem:[%s1395_s0 + $0x18] sm:$0xff]   ;;  %v49_v11 = vld [vmem:[%s1398_s4] sm:$0xff]  ;;  %v1170_v13 = vld [vmem:[%s1396_s1 + $0x8] sm:$0xff]  }
   0x5   :  { %946 = vmatprep.mubr.msk.f32.mxu0 %vm94_vm0, %v764_v4  ;;  %v51_v14 = vld [vmem:[%s1398_s4 + $0x10] sm:$0xff]  ;;  %v52_v16 = vld [vmem:[%s1398_s4 + $0x18] sm:$0xff]  ;;  %v768_v17 = vunpack.c.l.bf16 %v1170_v13  ;;  %v53_v18 = vld [vmem:[%s1398_s4 + $0x20] sm:$0x1]  ;;  %v769_v19 = vunpack.c.h.bf16 %v1170_v13  ;;  %960 = vmatprep.mubr.msk.f32.mxu1 %vm1076_vm1, %v1077_v21 }
   0x6   :  { %91 = vperm.xlu1 %1073, %v48_v9   ;;  %v1217_v39 = vld [vmem:[%s1400_s3] sm:$0xff]   ;;  %v879_v43 = vld [vmem:[%s1395_s0 + $0x28] sm:$0xff]   ;;  %v880_v46 = vld [vmem:[%s1395_s0 + $0x30] sm:$0xff]  }
   0x7   :  { %1027 = vmatpush3.bf16.msra.mxu0 %v872_v1  ;;  %v878_v41 = vld [vmem:[%s1395_s0 + $0x20] sm:$0xff]   ;;  %v772_v42 = vunpack.c.l.bf16 %v1217_v39  ;;  %v773_v44 = vunpack.c.h.bf16 %v1217_v39  ;;  %v1239_v45 = vld [vmem:[%s1400_s3 + $0x8] sm:$0xff]   ;;  %v881_v48 = vld [vmem:[%s1395_s0 + $0x38] sm:$0xff]  }
   0x8   :  { %1029 = vmatprep.subr.bf16.mxu0 %v873_v7  ;;  %81 = vperm.xlu0 %1072, %v46_v8   ;;  %v776_v47 = vunpack.c.l.bf16 %v1239_v45  ;;  %v777_v49 = vunpack.c.h.bf16 %v1239_v45  ;;  %v1262_v50 = vld [vmem:[%s1400_s3 + $0x10] sm:$0x1]  ;;  %v1296_v57 = vld [vmem:[%s1401_s5] sm:$0xff]  ;;  %v1301_v58 = vld [vmem:[%s1401_s5 + $0x8] sm:$0xff] }
   0x9   :  { %v44_v51 = vunpack.c.l.bf16 %v1262_v50  ;;  %v1325_v8 = vld [vmem:[%s1401_s5 + $0x18] sm:$0xff] }
   0xa   :  { %223 = vperm.xlu1 %1073, %v50_v12  }
   0xb   :  { %1031 = vmatpush3.bf16.msra.mxu0 %v873_v7  ;;  %v1320_v7 = vld [vmem:[%s1401_s5 + $0x10] sm:$0xff] }
   0xc   :  { %1033 = vmatprep.subr.bf16.mxu0 %v874_v10  ;;  %218 = vperm.xlu0 %1072, %v49_v11  }
   0xe   :  { %233 = vperm.xlu1 %1073, %v52_v16  }
   0xf   :  { %1035 = vmatpush3.bf16.msra.mxu0 %v874_v10 }
  0x10   :  { %228 = vperm.xlu0 %1072, %v51_v14   ;;  %1058 = vmatprep.subr.bf16.mxu0 %v1075_v20 }
  0x12   :  { %947 = vmatmul.mubr.msk.f32.vlgmr.msra.gmra.mrb[0].mxu0 %vm94_vm0, %v765_v15 }
  0x13   :  { %949 = vmatprep.mubr.msk.f32.mxu0 %vm94_vm0, %v768_v17 }
  0x14   :  { %238 = vperm.xlu0 %1072, %v53_v18  }
  0x16   :  { %950 = vmatmul.mubr.msk.f32.gmra.mrb[2].mxu0 %vm94_vm0, %v769_v19 }
  0x17   :  { %1005 = vmatprep.mubr.msk.f32.mxu0 %vm1076_vm1, %v1077_v21 }
  0x81   :  { %v1201_v23 = vpop.permute.xlu1 %86 }
  0x83   :  { %v1199_v22 = vpop.permute.xlu0 %76 }
  0x85   :  { %v1207_v30 = vpop.permute.xlu1 %91 }
  0x87   :  { %v1203_v24 = vpop.permute.xlu0 %81 }
  0x89   :  { %v1291_v56 = vpop.permute.xlu1 %223 }
  0x8b   :  { %v1288_v54 = vpop.permute.xlu0 %218 }
  0x8d   :  { %v1315_v6 = vpop.permute.xlu1 %233 }
  0xe5   :  { %v948_v25 = vpop.f32.mrb[0].mxu0 }
  0xe6   :  { %v179_v26 = vadd.f32 %v948_v25, %v1203_v24  ;;  %v173_v27 = vpop.f32.mrb[1].mxu0 }
  0xe7   :  { %v174_v28 = vadd.f32 %v173_v27, %v1199_v22 }
  0xe8   :  { %v193_v29 = vmax.f32 %v179_v26, 0.0 }
  0xe9   :  { %v192_v31 = vmax.f32 %v174_v28, 0.0  ;;  %v951_v32 = vpop.f32.mrb[2].mxu0 }
  0xea   :  { %v189_v33 = vadd.f32 %v951_v32, %v1207_v30  ;;  %v183_v34 = vpop.f32.mrb[3].mxu0 }
  0xeb   :  { %v184_v35 = vadd.f32 %v183_v34, %v1201_v23  ;;  %v797_v36 = vpack.c.bf16 %v193_v29, %v192_v31 }
  0xec   :  { %v195_v37 = vmax.f32 %v189_v33, 0.0 }
  0xed   :  { %v194_v38 = vmax.f32 %v184_v35, 0.0  ;;  %798 = vst [vmem:[%s1399_s6] sm:$0xff] %v797_v36   ;;  %1038 = vmatpush3.bf16.msra.mxu1 %v797_v36 }
  0xee   :  { %1039 = vmatprep.subr.bf16.mxu1 %v1075_v20 }
  0xef   :  { %v802_v40 = vpack.c.bf16 %v195_v37, %v194_v38 }
  0xf1   :  { %875 = vst [vmem:[%s1399_s6 + $0x8] sm:$0xff] %v802_v40   ;;  %1041 = vmatpush3.bf16.msra.mxu1 %v802_v40 }
  0xf2   :  { %1043 = vmatprep.subr.bf16.mxu1 %v878_v41 }
  0xf4   :  { %961 = vmatmul.mubr.msk.f32.vlgmr.msra.gmra.mrb[0].mxu1 %vm241_vm2, %v772_v42 }
  0xf5   :  { %1045 = vmatpush3.bf16.msra.mxu1 %v878_v41  ;;  %963 = vmatprep.mubr.msk.f32.mxu1 %vm1076_vm1, %v1077_v21 }
  0xf6   :  { %1047 = vmatprep.subr.bf16.mxu1 %v879_v43 }
  0xf8   :  { %964 = vmatmul.mubr.msk.f32.gmra.mrb[2].mxu1 %vm241_vm2, %v773_v44 }
  0xf9   :  { %1049 = vmatpush3.bf16.msra.mxu1 %v879_v43  ;;  %966 = vmatprep.mubr.msk.f32.mxu1 %vm1076_vm1, %v1077_v21 }
  0xfa   :  { %1051 = vmatprep.subr.bf16.mxu1 %v880_v46 }
  0xfc   :  { %967 = vmatmul.mubr.msk.f32.gmra.mrb[4].mxu1 %vm241_vm2, %v776_v47 }
  0xfd   :  { %969 = vmatprep.mubr.msk.f32.mxu1 %vm1076_vm1, %v1077_v21  ;;  %1053 = vmatpush3.bf16.msra.mxu1 %v880_v46 }
  0xfe   :  { %1055 = vmatprep.subr.bf16.mxu1 %v881_v48 }
 0x100   :  { %970 = vmatmul.mubr.msk.f32.gmra.mrb[6].mxu1 %vm241_vm2, %v777_v49 }
 0x101   :  { %972 = vmatprep.mubr.msk.f32.mxu1 %vm1076_vm1, %v1077_v21  ;;  %1057 = vmatpush3.bf16.msra.mxu1 %v881_v48 }
 0x102   :  { %1064 = vmatprep.subr.bf16.mxu1 %v1075_v20 }
 0x104   :  { %973 = vmatmul.mubr.msk.f32.gmra.mrb[8].mxu1 %vm241_vm2, %v44_v51 }
 0x105   :  { %991 = vmatprep.mubr.msk.f32.mxu1 %vm94_vm0, %v764_v4  ;;  %v1309_v4 = vpop.permute.xlu0 %228 }
 0x108   :  { %992 = vmatmul.mubr.msk.f32.vlgmr.msra.gmra.mrb[10].mxu1 %vm94_vm0, %v765_v15 }
 0x109   :  { %994 = vmatprep.mubr.msk.f32.mxu1 %vm94_vm0, %v768_v17  ;;  %v239_v15 = vpop.permute.xlu0 %238 }
 0x10c   :  { %995 = vmatmul.mubr.msk.f32.gmra.mrb[12].mxu1 %vm94_vm0, %v769_v19 }
 0x10d   :  { %1017 = vmatprep.mubr.msk.f32.mxu1 %vm1076_vm1, %v1077_v21 }
 0x1c7   :  { %v323_v52 = vpop.f32.mrb[0].mxu1 }
 0x1c8   :  { %v962_v53 = vpop.f32.mrb[1].mxu1  ;;  %v324_v55 = vadd.f32 %v323_v52, %v1288_v54 }
 0x1ca   :  { %v367_v62 = vadd.f32 %v324_v55, %v1296_v57 }
 0x1cb   :  { %v328_v59 = vpop.f32.mrb[2].mxu1 }
 0x1cc   :  { %v329_v60 = vadd.f32 %v328_v59, %v1291_v56  ;;  %v965_v61 = vpop.f32.mrb[3].mxu1 }
 0x1ce   :  { %v807_v63 = vpack.c.bf16 %v329_v60, %v324_v55  ;;  %v368_v0 = vadd.f32 %v329_v60, %v1301_v58 }
 0x1cf   :  { %v333_v1 = vpop.f32.mrb[4].mxu1 }
 0x1d0   :  { %808 = vst [vmem:[%s1402_s7] sm:$0xff] %v807_v63   ;;  %v817_v2 = vpack.c.bf16 %v368_v0, %v367_v62  ;;  %v968_v3 = vpop.f32.mrb[5].mxu1  ;;  %v334_v5 = vadd.f32 %v333_v1, %v1309_v4 }
 0x1d2   :  { %818 = vst [vmem:[%s1403_s8] sm:$0xff] %v817_v2   ;;  %v369_v12 = vadd.f32 %v334_v5, %v1320_v7 }
 0x1d3   :  { %v338_v9 = vpop.f32.mrb[6].mxu1 }
 0x1d4   :  { %v339_v10 = vadd.f32 %v338_v9, %v1315_v6  ;;  %v971_v11 = vpop.f32.mrb[7].mxu1 }
 0x1d6   :  { %v812_v13 = vpack.c.bf16 %v339_v10, %v334_v5  ;;  %v370_v14 = vadd.f32 %v339_v10, %v1325_v8 }
 0x1d7   :  { %v343_v16 = vpop.f32.mrb[8].mxu1 }
 0x1d8   :  { %876 = vst [vmem:[%s1402_s7 + $0x8] sm:$0xff] %v812_v13   ;;  %v822_v17 = vpack.c.bf16 %v370_v14, %v369_v12  ;;  %v344_v18 = vadd.f32 %v343_v16, %v239_v15  ;;  %v974_v19 = vpop.f32.mrb[9].mxu1 }
 0x1da   :  { %877 = vst [vmem:[%s1403_s8 + $0x8] sm:$0xff] %v822_v17   ;;  %v391_v25 = vmax.f32 %v344_v18, 0.0 }
 0x1db   :  { %v993_v26 = vpop.f32.mrb[10].mxu1 }
 0x1dc   :  { %392 = vst [vmem:[%s1404_s9] sm:$0x1] %v391_v25  ;;  %v482_v27 = vadd.f32 %v993_v26, %v1203_v24  ;;  %v476_v28 = vpop.f32.mrb[11].mxu1 }
 0x1dd   :  { %v477_v29 = vadd.f32 %v476_v28, %v1199_v22 }
 0x1de   :  { %v496_v31 = vmax.f32 %v482_v27, 0.0 }
 0x1df   :  { %v495_v32 = vmax.f32 %v477_v29, 0.0  ;;  %v996_v33 = vpop.f32.mrb[12].mxu1 }
 0x1e0   :  { %v492_v34 = vadd.f32 %v996_v33, %v1207_v30  ;;  %v486_v35 = vpop.f32.mrb[13].mxu1 }
 0x1e1   :  { %v843_v36 = vpack.c.bf16 %v496_v31, %v495_v32  ;;  %v487_v37 = vadd.f32 %v486_v35, %v1201_v23 }
 0x1e2   :  { %v498_v38 = vmax.f32 %v492_v34, 0.0 }
 0x1e3   :  { %882 = vst [vmem:[%s1399_s6 + $0x10] sm:$0xff] %v843_v36   ;;  %v497_v40 = vmax.f32 %v487_v37, 0.0  ;;  %1060 = vmatpush3.bf16.msra.mxu0 %v843_v36  ;;  %1066 = vmatpush3.bf16.msra.mxu1 %v843_v36 }
 0x1e4   :  { %1061 = vmatprep.subr.bf16.mxu0 %v1075_v20  ;;  %1065 = vmatprep.subr.bf16.mxu1 %v1075_v20 }
 0x1e5   :  { %v848_v22 = vpack.c.bf16 %v498_v38, %v497_v40 }
 0x1e7   :  { %883 = vst [vmem:[%s1399_s6 + $0x18] sm:$0xff] %v848_v22   ;;  %1063 = vmatpush3.bf16.msra.mxu0 %v848_v22  ;;  %1067 = vmatpush3.bf16.msra.mxu1 %v848_v22 }
 0x1ea   :  { %1006 = vmatmul.mubr.msk.f32.vlgmr.msra.gmra.mrb[4].mxu0 %vm241_vm2, %v772_v42  ;;  %1018 = vmatmul.mubr.msk.f32.vlgmr.msra.gmra.mrb[14].mxu1 %vm241_vm2, %v44_v51 }
 0x1eb   :  { %1008 = vmatprep.mubr.msk.f32.mxu0 %vm1076_vm1, %v1077_v21 }
 0x1ee   :  { %1009 = vmatmul.mubr.msk.f32.gmra.mrb[6].mxu0 %vm241_vm2, %v773_v44 }
 0x1ef   :  { %1011 = vmatprep.mubr.msk.f32.mxu0 %vm1076_vm1, %v1077_v21 }
 0x1f2   :  { %1012 = vmatmul.mubr.msk.f32.gmra.mrb[8].mxu0 %vm241_vm2, %v776_v47 }
 0x1f3   :  { %1014 = vmatprep.mubr.msk.f32.mxu0 %vm1076_vm1, %v1077_v21 }
 0x1f6   :  { %1015 = vmatmul.mubr.msk.f32.gmra.mrb[10].mxu0 %vm241_vm2, %v777_v49 }
 0x2bd   :  { %v586_v20 = vpop.f32.mrb[4].mxu0  ;;  %v606_v23 = vpop.f32.mrb[14].mxu1 }
 0x2be   :  { %v607_v24 = vadd.f32 %v606_v23, %v239_v15  ;;  %v1007_v30 = vpop.f32.mrb[5].mxu0  ;;  %v1019_v39 = vpop.f32.mrb[15].mxu1  ;;  %v587_v41 = vadd.f32 %v586_v20, %v1288_v54 }
 0x2c0   :  { %v656_v42 = vmax.f32 %v607_v24, 0.0  ;;  %v631_v45 = vadd.f32 %v587_v41, %v1296_v57 }
 0x2c1   :  { %v591_v43 = vpop.f32.mrb[6].mxu0 }
 0x2c2   :  { %737 = vst [vmem:[%s1404_s9 + $0x1] sm:$0x1] %v656_v42  ;;  %v592_v44 = vadd.f32 %v591_v43, %v1291_v56  ;;  %v1010_v21 = vpop.f32.mrb[7].mxu0 }
 0x2c4   :  { %v853_v46 = vpack.c.bf16 %v592_v44, %v587_v41  ;;  %v632_v47 = vadd.f32 %v592_v44, %v1301_v58 }
 0x2c5   :  { %v596_v48 = vpop.f32.mrb[8].mxu0 }
 0x2c6   :  { %884 = vst [vmem:[%s1402_s7 + $0x10] sm:$0xff] %v853_v46   ;;  %v863_v49 = vpack.c.bf16 %v632_v47, %v631_v45  ;;  %v1013_v50 = vpop.f32.mrb[9].mxu0  ;;  %v597_v51 = vadd.f32 %v596_v48, %v1309_v4 }
 0x2c8   :  { %886 = vst [vmem:[%s1403_s8 + $0x10] sm:$0xff] %v863_v49   ;;  %v633_v55 = vadd.f32 %v597_v51, %v1320_v7 }
 0x2c9   :  { %v601_v52 = vpop.f32.mrb[10].mxu0 }
 0x2ca   :  { %v602_v53 = vadd.f32 %v601_v52, %v1315_v6  ;;  %v1016_v54 = vpop.f32.mrb[11].mxu0 }
 0x2cc   :  { %v858_v56 = vpack.c.bf16 %v602_v53, %v597_v51  ;;  %v634_v57 = vadd.f32 %v602_v53, %v1325_v8 }
 0x2ce   :  { %885 = vst [vmem:[%s1402_s7 + $0x18] sm:$0xff] %v858_v56   ;;  %v868_v58 = vpack.c.bf16 %v634_v57, %v633_v55 }
 0x2d0   :  { %887 = vst [vmem:[%s1403_s8 + $0x18] sm:$0xff] %v868_v58  }

</bundles_post_ra>
